<compile_context>
chip_gen: v7x
topology: tpu7x:2x2x1
jax: 0.10.0
libtpu: 0.0.40
codegen_flags: <defaults>
</compile_context>

<pallas_src>
import functools

import jax
import jax.numpy as jnp
from jax.experimental import pallas as pl
from jax.experimental.pallas import tpu as pltpu

# ----------------------------- model hyper-params ---------------------------
CIN = 4            # input channels
FEAT = 32          # backbone feature channels
NUM_SEM = 8        # semantic classes
NUM_ANCHORS = 3    # anchors per location
NUM_DET_CLS = 4    # detection classes
NUM_IMG_CLS = 10   # image-level classes

K1 = CIN * 9                                                      # im2col width
NOUT = NUM_SEM + NUM_ANCHORS * NUM_DET_CLS + NUM_ANCHORS * 4 + 1  # 33
NOUT_PAD = 128                                                    # lane-dense width
DEPTH_COL = NOUT - 1                                              # sigmoid column


# ------------------------------ Pallas kernel --------------------------------
def _fused_multitask_kernel(cols_ref, w1_ref, b1_ref, wh_ref, bh_ref,
                            heads_ref, pooled_ref, *, hw):
    """One row tile: backbone conv -> ReLU -> all heads -> pooled partial sums.

    cols_ref  : (tm, K1)          bf16  im2col rows of the input
    w1_ref    : (K1, FEAT)        bf16  backbone conv weight
    b1_ref    : (1, FEAT)         f32
    wh_ref    : (FEAT, NOUT_PAD)  bf16  all heads concatenated + zero padded
    bh_ref    : (1, NOUT_PAD)     f32
    heads_ref : (tm, NOUT_PAD)    bf16  per-pixel head outputs (lane dense)
    pooled_ref: (1, n_img, FEAT)  f32   per-tile, per-image feature sums
    hw        : static H*W (rows per image)
    """
    tm = cols_ref.shape[0]
    n_img = pooled_ref.shape[1]

    # Backbone 3x3 conv (as matmul) + bias + ReLU; feats stay in VMEM/vregs.
    feats = jnp.dot(cols_ref[...], w1_ref[...],
                    preferred_element_type=jnp.float32)
    feats = jnp.maximum(feats + b1_ref[...], 0.0)                 # (tm, FEAT) f32

    # All four pixel heads in one MXU matmul onto a 128-wide output.
    y = jnp.dot(feats.astype(jnp.bfloat16), wh_ref[...],
                preferred_element_type=jnp.float32) + bh_ref[...]
    col = jax.lax.broadcasted_iota(jnp.int32, y.shape, 1)
    sig = 0.5 * (jnp.tanh(0.5 * y) + 1.0)          # EUP-friendly sigmoid
    heads_ref[...] = jnp.where(col == DEPTH_COL, sig, y).astype(heads_ref.dtype)

    # In-kernel 0/1 image-membership mask (no HBM pool_map stream); padded
    # rows (global row >= n_img*hw) fall outside every image range -> zero.
    row = (pl.program_id(0) * tm
           + jax.lax.broadcasted_iota(jnp.int32, (n_img, tm), 1))
    img = jax.lax.broadcasted_iota(jnp.int32, (n_img, tm), 0)
    pool = ((row >= img * hw) & (row < (img + 1) * hw)).astype(jnp.bfloat16)

    # Global-average-pool partial sums per image: one (N, tm) @ (tm, F) matmul.
    pooled_ref[0] = jnp.dot(pool, feats.astype(jnp.bfloat16),
                            preferred_element_type=jnp.float32)   # (n_img, FEAT)


# ------------------------------ JAX glue --------------------------------------
def im2col_3x3(x):
    """x: (N, C, H, W), stride 1, pad 1 -> (N*H*W, C*9); C outer, (kh,kw) inner."""
    N, C, H, W = x.shape
    xp = jnp.pad(x, ((0, 0), (0, 0), (1, 1), (1, 1)))
    cols = [xp[:, :, di:di + H, dj:dj + W] for di in range(3) for dj in range(3)]
    cols = jnp.stack(cols, axis=2)                  # (N, C, 9, H, W)
    cols = cols.reshape(N, C * 9, H, W).transpose(0, 2, 3, 1)     # (N, H, W, C*9)
    return cols.reshape(N * H * W, C * 9)


def _choose_tm(m, target=1024):
    """Large row tiles for pipelining; >=2 tiles when possible (v7x megacore)."""
    if m >= 2 * target:
        return target
    half = (m + 1) // 2
    return max(16, ((half + 15) // 16) * 16)


def init_params(key):
    """Parameters in PyTorch layouts."""
    ks = jax.random.split(key, 6)

    def w(k, shape, fan_in):
        return jax.random.normal(k, shape, jnp.float32) * (1.0 / jnp.sqrt(fan_in))

    return {
        "backbone_w": w(ks[0], (FEAT, CIN, 3, 3), CIN * 9),
        "backbone_b": jnp.zeros((FEAT,), jnp.float32),
        "sem_w": w(ks[1], (NUM_SEM, FEAT), FEAT),
        "sem_b": jnp.zeros((NUM_SEM,), jnp.float32),
        "det_cls_w": w(ks[2], (NUM_ANCHORS * NUM_DET_CLS, FEAT), FEAT),
        "det_cls_b": jnp.zeros((NUM_ANCHORS * NUM_DET_CLS,), jnp.float32),
        "det_reg_w": w(ks[3], (NUM_ANCHORS * 4, FEAT), FEAT),
        "det_reg_b": jnp.zeros((NUM_ANCHORS * 4,), jnp.float32),
        "depth_w": w(ks[4], (1, FEAT), FEAT),
        "depth_b": jnp.zeros((1,), jnp.float32),
        "cls_w": w(ks[5], (NUM_IMG_CLS, FEAT), FEAT),
        "cls_b": jnp.zeros((NUM_IMG_CLS,), jnp.float32),
        "log_vars": jnp.zeros((4,), jnp.float32),
    }


def prepare_params(params):
    """One-time preprocessing: MXU-friendly layouts, concatenated heads, bf16."""
    w1 = params["backbone_w"].reshape(FEAT, K1).T.astype(jnp.bfloat16)   # (K1, F)
    b1 = params["backbone_b"].reshape(1, FEAT).astype(jnp.float32)

    wh = jnp.concatenate([params["sem_w"], params["det_cls_w"],
                          params["det_reg_w"], params["depth_w"]], axis=0)  # (33, F)
    wh = jnp.pad(wh, ((0, NOUT_PAD - NOUT), (0, 0))).T.astype(jnp.bfloat16)  # (F, 128)
    bh = jnp.concatenate([params["sem_b"], params["det_cls_b"],
                          params["det_reg_b"], params["depth_b"]], axis=0)
    bh = jnp.pad(bh, (0, NOUT_PAD - NOUT)).reshape(1, NOUT_PAD).astype(jnp.float32)

    return {
        "w1": w1, "b1": b1, "wh": wh, "bh": bh,
        "cls_wt": params["cls_w"].T.astype(jnp.float32),     # (FEAT, NUM_IMG_CLS)
        "cls_b": params["cls_b"],
        "log_vars": params["log_vars"],
    }


def multitask_forward(x, prep):
    """x: (N, Cin, H, W) f32 NCHW -> dict of task outputs (NCHW / (N, C))."""
    N, _, H, W = x.shape
    M = N * H * W
    tm = _choose_tm(M)
    grid_m = (M + tm - 1) // tm
    m_pad = grid_m * tm

    # im2col rows (bf16 halves HBM traffic of the dominant input tensor).
    # TODO(synk): replace with in-kernel shifted-accumulate conv (halo tiles)
    #             to avoid the 9x im2col read amplification.
    cols = im2col_3x3(x.astype(jnp.bfloat16))                     # (M, K1)
    if m_pad != M:
        cols = jnp.pad(cols, ((0, m_pad - M), (0, 0)))

    heads, pooled_parts = pl.pallas_call(
        functools.partial(_fused_multitask_kernel, hw=H * W),
        out_shape=(
            jax.ShapeDtypeStruct((m_pad, NOUT_PAD), jnp.bfloat16),
            jax.ShapeDtypeStruct((grid_m, N, FEAT), jnp.float32),
        ),
        grid=(grid_m,),
        in_specs=[
            pl.BlockSpec((tm, K1), lambda i: (i, 0)),
            pl.BlockSpec((K1, FEAT), lambda i: (0, 0)),
            pl.BlockSpec((1, FEAT), lambda i: (0, 0)),
            pl.BlockSpec((FEAT, NOUT_PAD), lambda i: (0, 0)),
            pl.BlockSpec((1, NOUT_PAD), lambda i: (0, 0)),
        ],
        out_specs=(
            pl.BlockSpec((tm, NOUT_PAD), lambda i: (i, 0)),
            pl.BlockSpec((1, N, FEAT), lambda i: (i, 0, 0)),
        ),
        compiler_params=pltpu.CompilerParams(dimension_semantics=("parallel",)),
    )(cols, prep["w1"], prep["b1"], prep["wh"], prep["bh"])

    # Single bf16 transpose to NCHW, upcast once, then slice channels.
    heads = heads[:M, :NOUT].reshape(N, H, W, NOUT)               # bf16
    heads = heads.transpose(0, 3, 1, 2).astype(jnp.float32)       # (N, 33, H, W)

    o = 0
    semantic = heads[:, o:o + NUM_SEM]; o += NUM_SEM
    c_det = NUM_ANCHORS * NUM_DET_CLS
    detection_cls = heads[:, o:o + c_det]; o += c_det
    c_reg = NUM_ANCHORS * 4
    detection_reg = heads[:, o:o + c_reg]; o += c_reg
    depth = heads[:, o:o + 1]

    # Classification: finish the global average pool and a tiny linear in jnp.
    pooled = pooled_parts.sum(axis=0) / float(H * W)              # (N, FEAT)
    classification = pooled @ prep["cls_wt"] + prep["cls_b"]      # (N, NUM_IMG_CLS)

    return {
        "semantic": semantic,
        "detection_cls": detection_cls,
        "detection_reg": detection_reg,
        "classification": classification,
        "depth": depth,
    }


def get_uncertainty_weights(prep):
    return jnp.exp(-prep["log_vars"])


# ------------------------------ entry point ----------------------------------
if __name__ == "__main__":
    key = jax.random.PRNGKey(0)
    kx, kp = jax.random.split(key)
    x = jax.random.normal(kx, (2, CIN, 16, 16), jnp.float32)
    params = init_params(kp)
    prep = prepare_params(params)

    out = jax.jit(multitask_forward)(x, prep)
    jax.block_until_ready(out)

    assert out["semantic"].shape == (2, NUM_SEM, 16, 16)
    assert out["detection_cls"].shape == (2, NUM_ANCHORS * NUM_DET_CLS, 16, 16)
    assert out["detection_reg"].shape == (2, NUM_ANCHORS * 4, 16, 16)
    assert out["classification"].shape == (2, NUM_IMG_CLS)
    assert out["depth"].shape == (2, 1, 16, 16)
    assert bool(jnp.all(jnp.isfinite(out["classification"])))

    print("KERNEL_OK")
</pallas_src>

<mosaic_0001>
module attributes {stable_mosaic.version = 11 : i64} {
  func.func @_fused_multitask_kernel(%arg0: i32, %arg1: memref<256x36xbf16, #tpu.memory_space<vmem>>, %arg2: memref<36x32xbf16, #tpu.memory_space<vmem>>, %arg3: memref<1x32xf32, #tpu.memory_space<vmem>>, %arg4: memref<32x128xbf16, #tpu.memory_space<vmem>>, %arg5: memref<1x128xf32, #tpu.memory_space<vmem>>, %arg6: memref<256x128xbf16, #tpu.memory_space<vmem>>, %arg7: memref<1x2x32xf32, #tpu.memory_space<vmem>>) attributes {dimension_semantics = [#tpu.dimension_semantics<parallel>], iteration_bounds = array<i64: 2>, scalar_prefetch = 0 : i64, scratch_operands = 0 : i64, tpu.core_type = #tpu.core_type<tc>, window_params = [{transform_indices = @transform_0, window_bounds = array<i64: 256, 36>}, {pipeline_mode = #tpu.pipeline_mode<synchronous>, transform_indices = @transform_1, window_bounds = array<i64: 36, 32>}, {pipeline_mode = #tpu.pipeline_mode<synchronous>, transform_indices = @transform_2, window_bounds = array<i64: 1, 32>}, {pipeline_mode = #tpu.pipeline_mode<synchronous>, transform_indices = @transform_3, window_bounds = array<i64: 32, 128>}, {pipeline_mode = #tpu.pipeline_mode<synchronous>, transform_indices = @transform_4, window_bounds = array<i64: 1, 128>}, {transform_indices = @transform_5, window_bounds = array<i64: 256, 128>}, {transform_indices = @transform_6, window_bounds = array<i64: 1, 2, 32>}]} {
    %c0 = arith.constant 0 : index
    %c0_0 = arith.constant 0 : index
    %0 = vector.load %arg1[%c0, %c0_0] : memref<256x36xbf16, #tpu.memory_space<vmem>>, vector<256x36xbf16>
    %c0_1 = arith.constant 0 : index
    %c0_2 = arith.constant 0 : index
    %1 = vector.load %arg2[%c0_1, %c0_2] : memref<36x32xbf16, #tpu.memory_space<vmem>>, vector<36x32xbf16>
    %cst = arith.constant dense<0.000000e+00> : vector<256x32xf32>
    %2 = tpu.matmul %0, %1, %cst {dimension_numbers = #tpu.dot_dimension_numbers<[1], [0], [0], [1], [0, 0, 1, 1], [], []>} : vector<256x36xbf16>, vector<36x32xbf16>, vector<256x32xf32> -> vector<256x32xf32>
    %c0_3 = arith.constant 0 : index
    %c0_4 = arith.constant 0 : index
    %3 = vector.load %arg3[%c0_3, %c0_4] : memref<1x32xf32, #tpu.memory_space<vmem>>, vector<1x32xf32>
    %4 = vector.broadcast %3 : vector<1x32xf32> to vector<256x32xf32>
    %5 = arith.addf %2, %4 : vector<256x32xf32>
    %cst_5 = arith.constant 0.000000e+00 : f32
    %6 = vector.broadcast %cst_5 : f32 to vector<256x32xf32>
    %7 = arith.maximumf %5, %6 : vector<256x32xf32>
    %8 = arith.truncf %7 : vector<256x32xf32> to vector<256x32xbf16>
    %c0_6 = arith.constant 0 : index
    %c0_7 = arith.constant 0 : index
    %9 = vector.load %arg4[%c0_6, %c0_7] : memref<32x128xbf16, #tpu.memory_space<vmem>>, vector<32x128xbf16>
    %cst_8 = arith.constant dense<0.000000e+00> : vector<256x128xf32>
    %10 = tpu.matmul %8, %9, %cst_8 {dimension_numbers = #tpu.dot_dimension_numbers<[1], [0], [0], [1], [0, 0, 1, 1], [], []>} : vector<256x32xbf16>, vector<32x128xbf16>, vector<256x128xf32> -> vector<256x128xf32>
    %c0_9 = arith.constant 0 : index
    %c0_10 = arith.constant 0 : index
    %11 = vector.load %arg5[%c0_9, %c0_10] : memref<1x128xf32, #tpu.memory_space<vmem>>, vector<1x128xf32>
    %12 = vector.broadcast %11 : vector<1x128xf32> to vector<256x128xf32>
    %13 = arith.addf %10, %12 : vector<256x128xf32>
    %14 = tpu.iota {dimensions = array<i32: 1>} : vector<256x128xi32>
    %cst_11 = arith.constant 5.000000e-01 : f32
    %15 = vector.broadcast %cst_11 : f32 to vector<256x128xf32>
    %16 = arith.mulf %15, %13 : vector<256x128xf32>
    %17 = math.tanh %16 : vector<256x128xf32>
    %cst_12 = arith.constant 1.000000e+00 : f32
    %18 = vector.broadcast %cst_12 : f32 to vector<256x128xf32>
    %19 = arith.addf %17, %18 : vector<256x128xf32>
    %cst_13 = arith.constant 5.000000e-01 : f32
    %20 = vector.broadcast %cst_13 : f32 to vector<256x128xf32>
    %21 = arith.mulf %20, %19 : vector<256x128xf32>
    %c32_i32 = arith.constant 32 : i32
    %22 = vector.broadcast %c32_i32 : i32 to vector<256x128xi32>
    %23 = arith.cmpi eq, %14, %22 : vector<256x128xi32>
    %24 = arith.select %23, %21, %13 : vector<256x128xi1>, vector<256x128xf32>
    %25 = arith.truncf %24 : vector<256x128xf32> to vector<256x128xbf16>
    %c0_14 = arith.constant 0 : index
    %c0_15 = arith.constant 0 : index
    %26 = vector.load %arg6[%c0_14, %c0_15] : memref<256x128xbf16, #tpu.memory_space<vmem>>, vector<256x128xbf16>
    tpu.vector_store %arg6[%c0_14, %c0_15], %25 {strides = array<i32>} : memref<256x128xbf16, #tpu.memory_space<vmem>>, vector<256x128xbf16>,
    %c256_i32 = arith.constant 256 : i32
    %27 = arith.muli %arg0, %c256_i32 : i32
    %28 = tpu.iota {dimensions = array<i32: 1>} : vector<2x256xi32>
    %29 = vector.broadcast %27 : i32 to vector<2x256xi32>
    %30 = arith.addi %29, %28 : vector<2x256xi32>
    %31 = tpu.iota {dimensions = array<i32: 0>} : vector<2x256xi32>
    %c256_i32_16 = arith.constant 256 : i32
    %32 = vector.broadcast %c256_i32_16 : i32 to vector<2x256xi32>
    %33 = arith.muli %31, %32 : vector<2x256xi32>
    %34 = arith.cmpi sge, %30, %33 : vector<2x256xi32>
    %c1_i32 = arith.constant 1 : i32
    %35 = vector.broadcast %c1_i32 : i32 to vector<2x256xi32>
    %36 = arith.addi %31, %35 : vector<2x256xi32>
    %c256_i32_17 = arith.constant 256 : i32
    %37 = vector.broadcast %c256_i32_17 : i32 to vector<2x256xi32>
    %38 = arith.muli %36, %37 : vector<2x256xi32>
    %39 = arith.cmpi slt, %30, %38 : vector<2x256xi32>
    %40 = arith.andi %34, %39 : vector<2x256xi1>
    %41 = arith.extui %40 : vector<2x256xi1> to vector<2x256xi32>
    %42 = arith.sitofp %41 : vector<2x256xi32> to vector<2x256xf32>
    %43 = arith.truncf %42 : vector<2x256xf32> to vector<2x256xbf16>
    %44 = arith.truncf %7 : vector<256x32xf32> to vector<256x32xbf16>
    %cst_18 = arith.constant dense<0.000000e+00> : vector<2x32xf32>
    %45 = tpu.matmul %43, %44, %cst_18 {dimension_numbers = #tpu.dot_dimension_numbers<[1], [0], [0], [1], [0, 0, 1, 1], [], []>} : vector<2x256xbf16>, vector<256x32xbf16>, vector<2x32xf32> -> vector<2x32xf32>
    %c0_19 = arith.constant 0 : index
    %c0_20 = arith.constant 0 : index
    %c0_21 = arith.constant 0 : index
    %46 = vector.load %arg7[%c0_19, %c0_20, %c0_21] : memref<1x2x32xf32, #tpu.memory_space<vmem>>, vector<1x2x32xf32>
    %47 = vector.shape_cast %46 : vector<1x2x32xf32> to vector<2x32xf32>
    %48 = vector.shape_cast %45 : vector<2x32xf32> to vector<1x2x32xf32>
    tpu.vector_store %arg7[%c0_19, %c0_20, %c0_21], %48 {strides = array<i32>} : memref<1x2x32xf32, #tpu.memory_space<vmem>>, vector<1x2x32xf32>,
    return
  }
  func.func @transform_0(%arg0: i32) -> (i32, i32) {
    %c0_i32 = arith.constant 0 : i32
    %c0_i32_0 = arith.constant 0 : i32
    return %arg0, %c0_i32 : i32, i32
  }
  func.func @transform_1(%arg0: i32) -> (i32, i32) {
    %c0_i32 = arith.constant 0 : i32
    %c0_i32_0 = arith.constant 0 : i32
    %c0_i32_1 = arith.constant 0 : i32
    return %c0_i32, %c0_i32_0 : i32, i32
  }
  func.func @transform_2(%arg0: i32) -> (i32, i32) {
    %c0_i32 = arith.constant 0 : i32
    %c0_i32_0 = arith.constant 0 : i32
    %c0_i32_1 = arith.constant 0 : i32
    return %c0_i32, %c0_i32_0 : i32, i32
  }
  func.func @transform_3(%arg0: i32) -> (i32, i32) {
    %c0_i32 = arith.constant 0 : i32
    %c0_i32_0 = arith.constant 0 : i32
    %c0_i32_1 = arith.constant 0 : i32
    return %c0_i32, %c0_i32_0 : i32, i32
  }
  func.func @transform_4(%arg0: i32) -> (i32, i32) {
    %c0_i32 = arith.constant 0 : i32
    %c0_i32_0 = arith.constant 0 : i32
    %c0_i32_1 = arith.constant 0 : i32
    return %c0_i32, %c0_i32_0 : i32, i32
  }
  func.func @transform_5(%arg0: i32) -> (i32, i32) {
    %c0_i32 = arith.constant 0 : i32
    %c0_i32_0 = arith.constant 0 : i32
    return %arg0, %c0_i32 : i32, i32
  }
  func.func @transform_6(%arg0: i32) -> (i32, i32, i32) {
    %c0_i32 = arith.constant 0 : i32
    %c0_i32_0 = arith.constant 0 : i32
    %c0_i32_1 = arith.constant 0 : i32
    return %arg0, %c0_i32, %c0_i32_0 : i32, i32, i32
  }
}

</mosaic_0001>

<bundles_post_ra>
// kernel: multitask_forward.1
= control target key start
LH: loop header
LB: loop body
LE: loop exit
PB: predicated region body
PF: predicated region fallthrough
CT: control target
= control target key end

     0   :  { %s1880_s21 = smov 0   ;;  %s2290_s0 = inlined_call_operand.vmem [shape: bf16[512,36], index: 0, kind: input, shape index: {}]   ;;  %s2291_s1 = inlined_call_operand.vmem [shape: bf16[36,32], index: 1, kind: input, shape index: {}]   ;;  %s2292_s2 = inlined_call_operand.vmem [shape: f32[1,32], index: 2, kind: input, shape index: {}]   ;;  %s2293_s3 = inlined_call_operand.vmem [shape: bf16[32,128], index: 3, kind: input, shape index: {}]   ;;  %s2294_s4 = inlined_call_operand.vmem [shape: f32[1,128], index: 4, kind: input, shape index: {}]   ;;  %s2295_s5 = inlined_call_operand.vmem [shape: bf16[512,128], index: 5, kind: output, shape index: {0}]   ;;  %s2296_s6 = inlined_call_operand.vmem [shape: f32[2,2,32], index: 6, kind: output, shape index: {1}]  }
   0x1 LB: > { %s1886_s22 = sadd.s32 4294967295, %s1842_s21   ;;  %p1379_p0 = scmp.ge.s32.totalorder %s1842_s21, 1  ;;  %s1842_s21 = sphi %s1880_s21, %s17_s21  }
   0x2   : > { %p216_p1 = scmp.lt.s32.totalorder %s1842_s21, 3 }
   0x4   : > { %p217_p2 = pnand %p1379_p0, %p216_p1 }
   0x5   : > { %v1751_v0 = vld [vmem:[%s2291_s1] sm:$0xff] (!%p217_p2)   ;;  %v1752_v1 = vld [vmem:[%s2291_s1 + $0x8] sm:$0xff] (!%p217_p2)   ;;  %s1380_s27 = sshll.u32 (!%p217_p2), %s1886_s22, 5  ;;  %v1753_v2 = vld [vmem:[%s2291_s1 + $0x10] ss:$0 sps:$4 sm:$0x33] (!%p217_p2)  }
   0x6   : > { %220 = sbr.rel (%p217_p2) target bundleno = 534 (0x216), region = 40  ;;  %1667 = vmatprep.subr.bf16.mxu0 (!%p217_p2), %v1751_v0  ;;  %p251_p3 = scmp.lt.s32.totalorder (!%p217_p2), %s1380_s27, 63  ;;  %vm455_vm0 = vcmask (!%p217_p2), 1041408   ;;  %vm406_vm1 = vcmask (!%p217_p2), 293888   ;;  %v1770_v20 = vld [vmem:[%s2293_s3] sm:$0xff] (!%p217_p2)   ;;  %v1771_v21 = vld [vmem:[%s2293_s3 + $0x8] sm:$0xff] (!%p217_p2)  }
   0x7   : > { %1668 = vmatpush3.bf16.msra.mxu0 (!%p217_p2), %v1751_v0  ;;  %v457_v3 = vsel (!%p217_p2), %vm455_vm0, %v1753_v2, 0  ;;  %1705 = vmatprep.subr.bf16.mxu1 (!%p217_p2), %v1770_v20  ;;  %v1951_v22 = vld [vmem:[%s2292_s2] ss:$0 sm:$0xff] (!%p217_p2)  ;;  %vm691_vm2 = vcmask (!%p217_p2), 261120   ;;  %s1472_s16 = sshll.u32 (!%p217_p2), %s1886_s22, 8  ;;  %p262_p4 = scmp.lt.s32.totalorder (!%p217_p2), %s1886_s22, 1 }
   0x8   : > { %1669 = vmatprep.subr.bf16.mxu0 (!%p217_p2), %v1752_v1  ;;  %1706 = vmatpush3.bf16.msra.mxu1 (!%p217_p2), %v1770_v20  ;;  %vm1286_vm12 = vcmask (!%p217_p2), 254976  }
   0x9   : > { %1707 = vmatprep.subr.bf16.mxu1 (!%p217_p2), %v1771_v21 }
   0xb   : > { %1670 = vmatpush3.bf16.msra.mxu0 (!%p217_p2), %v1752_v1 }
   0xc   : > { %1741 = vmatprep.subr.msk.bf16.mxu0 (!%p217_p2), %vm455_vm0, %v1753_v2  ;;  %1708 = vmatpush3.bf16.msra.mxu1 (!%p217_p2), %v1771_v21 }
   0xd   : > { %s2300_s27 = smov (!%p251_p3, %s1380_s27), 63  ;;  %s2302_s22 = smov (!%p262_p4, %s1886_s22), 1 }
   0xe   : > { %s1381_s30 = sshll.u32 %s2300_s27, 2  ;;  %s1384_s24 = sshll.u32 %s2302_s22, 1 }
   0xf   : > { %s1908_s9 = scalar_lea.vmem %s2290_s0, %s1381_s30  ;;  %1672 = vmatpush3.bf16.msra.mxu0 %v457_v3  ;;  %s2094_s23 = scalar_lea.vmem %s2295_s5, %s1381_s30 }
  0x10   : > { %v1754_v4 = vld [vmem:[%s1908_s9] sm:$0xff]   ;;  %v1755_v5 = vld [vmem:[%s1908_s9 + $0x8] sm:$0xff]   ;;  %v1756_v6 = vld [vmem:[%s1908_s9 + $0x10] sm:$0xff]   ;;  %s265_s22 = scalar_lea.vmem %s2296_s6, %s1384_s24 }
  0x11   : > { %1673 = vmatprep.mubr.msk.bf16.mxu0 %vm406_vm1, %v1754_v4  ;;  %v1757_v7 = vld [vmem:[%s1908_s9 + $0x18] sm:$0xff]   ;;  %v1758_v8 = vld [vmem:[%s1908_s9 + $0x20] sm:$0xff]   ;;  %v1759_v9 = vld [vmem:[%s1908_s9 + $0x28] sm:$0xff]  }
  0x12   : > { %1674 = vmatmul.mubr.msk.bf16.vlgmr.msra.gmra.mrb[0].mxu0 %vm406_vm1, %v1755_v5  ;;  %v1760_v10 = vld [vmem:[%s1908_s9 + $0x30] sm:$0xff]   ;;  %v1761_v11 = vld [vmem:[%s1908_s9 + $0x38] sm:$0xff]   ;;  %v1762_v12 = vld [vmem:[%s1908_s9 + $0x40] sm:$0xff]  }
  0x13   : > { %1677 = vmatprep.mubr.msk.bf16.mxu0 %vm406_vm1, %v1756_v6  ;;  %v1763_v13 = vld [vmem:[%s1908_s9 + $0x48] sm:$0xff]   ;;  %v1764_v14 = vld [vmem:[%s1908_s9 + $0x50] sm:$0xff]   ;;  %v1765_v15 = vld [vmem:[%s1908_s9 + $0x58] sm:$0xff]  }
  0x14   : > { %v1766_v16 = vld [vmem:[%s1908_s9 + $0x60] sm:$0xff]   ;;  %v1767_v17 = vld [vmem:[%s1908_s9 + $0x68] sm:$0xff]   ;;  %v1768_v18 = vld [vmem:[%s1908_s9 + $0x70] sm:$0xff]  }
  0x15   : > { %v1769_v19 = vld [vmem:[%s1908_s9 + $0x78] sm:$0xff]  }
  0x1a   : > { %1678 = vmatmul.mubr.msk.bf16.gmra.mrb[4].mxu0 %vm406_vm1, %v1757_v7 }
  0x1b   : > { %1681 = vmatprep.mubr.msk.bf16.mxu0 %vm406_vm1, %v1758_v8 }
  0x22   : > { %1682 = vmatmul.mubr.msk.bf16.gmra.mrb[8].mxu0 %vm406_vm1, %v1759_v9 }
  0x23   : > { %1685 = vmatprep.mubr.msk.bf16.mxu0 %vm406_vm1, %v1760_v10 }
  0x2a   : > { %1686 = vmatmul.mubr.msk.bf16.gmra.mrb[12].mxu0 %vm406_vm1, %v1761_v11 }
  0x2b   : > { %1689 = vmatprep.mubr.msk.bf16.mxu0 %vm406_vm1, %v1762_v12 }
  0x32   : > { %1690 = vmatmul.mubr.msk.bf16.gmra.mrb[16].mxu0 %vm406_vm1, %v1763_v13 }
  0x33   : > { %1693 = vmatprep.mubr.msk.bf16.mxu0 %vm406_vm1, %v1764_v14 }
  0x3a   : > { %1694 = vmatmul.mubr.msk.bf16.gmra.mrb[20].mxu0 %vm406_vm1, %v1765_v15 }
  0x3b   : > { %1697 = vmatprep.mubr.msk.bf16.mxu0 %vm406_vm1, %v1766_v16 }
  0x42   : > { %1698 = vmatmul.mubr.msk.bf16.gmra.mrb[24].mxu0 %vm406_vm1, %v1767_v17 }
  0x43   : > { %1701 = vmatprep.mubr.msk.bf16.mxu0 %vm406_vm1, %v1768_v18 }
  0x4a   : > { %1702 = vmatmul.mubr.msk.bf16.gmra.mrb[28].mxu0 %vm406_vm1, %v1769_v19 }
  0xe5   : > { %v1675_v23 = vpop.f32.mrb[0].mxu0 }
  0xe6   : > { %v502_v24 = vadd.f32 %v1675_v23, %v1951_v22  ;;  %v493_v25 = vpop.f32.mrb[1].mxu0 }
  0xe7   : > { %v494_v26 = vadd.f32 %v1951_v22, %v493_v25  ;;  %v1676_v27 = vpop.f32.mrb[2].mxu0 }
  0xe8   : > { %v505_v28 = vadd.f32 %v1676_v27, %v1951_v22  ;;  %v496_v29 = vpop.f32.mrb[3].mxu0  ;;  %v622_v31 = vmax.f32 %v502_v24, 0.0 }
  0xe9   : > { %v497_v30 = vadd.f32 %v1951_v22, %v496_v29  ;;  %v620_v33 = vmax.f32 %v494_v26, 0.0 }
  0xea   : > { %v623_v32 = vmax.f32 %v505_v28, 0.0 }
  0xeb   : > { %v621_v34 = vmax.f32 %v497_v30, 0.0 }
  0xec   : > { %v1957_v35 = vpack.c.bf16 %v623_v32, %v622_v31 }
  0xed   : > { %v1679_v36 = vpop.f32.mrb[4].mxu0  ;;  %v1959_v37 = vpack.c.bf16 %v621_v34, %v620_v33 }
  0xee   : > { %v518_v38 = vadd.f32 %v1679_v36, %v1951_v22  ;;  %v509_v39 = vpop.f32.mrb[5].mxu0 }
  0xef   : > { %v510_v40 = vadd.f32 %v1951_v22, %v509_v39  ;;  %v1680_v41 = vpop.f32.mrb[6].mxu0  ;;  %1709 = vmatprep.mubr.msk.bf16.mxu1 %vm691_vm2, %v1959_v37  ;;  %v901_v39 = vlaneseq }
  0xf0   : > { %v521_v42 = vadd.f32 %v1680_v41, %v1951_v22  ;;  %v512_v43 = vpop.f32.mrb[7].mxu0  ;;  %1710 = vmatmul.mubr.msk.bf16.vlgmr.msra.gmra.mrb[0].mxu1 %vm691_vm2, %v1957_v35  ;;  %v626_v45 = vmax.f32 %v518_v38, 0.0 }
  0xf1   : > { %v513_v44 = vadd.f32 %v1951_v22, %v512_v43  ;;  %v624_v47 = vmax.f32 %v510_v40, 0.0 }
  0xf2   : > { %v627_v46 = vmax.f32 %v521_v42, 0.0 }
  0xf3   : > { %v625_v48 = vmax.f32 %v513_v44, 0.0 }
  0xf4   : > { %v1969_v49 = vpack.c.bf16 %v627_v46, %v626_v45  ;;  %v2012_v46 = vand.u32 127, %v901_v39 }
  0xf5   : > { %v1971_v50 = vpack.c.bf16 %v625_v48, %v624_v47  ;;  %v1683_v51 = vpop.f32.mrb[8].mxu0  ;;  %v1230_v47 = vshrl.u32 %v901_v39, 7 }
  0xf6   : > { %v534_v52 = vadd.f32 %v1683_v51, %v1951_v22  ;;  %v525_v53 = vpop.f32.mrb[9].mxu0  ;;  %vm1031_vm11 = vcmp.eq.s32.totalorder %v2012_v46, 32 }
  0xf7   : > { %v526_v54 = vadd.f32 %v1951_v22, %v525_v53  ;;  %v1684_v55 = vpop.f32.mrb[10].mxu0  ;;  %1713 = vmatprep.mubr.msk.bf16.mxu1 %vm691_vm2, %v1971_v50 }
  0xf8   : > { %v537_v56 = vadd.f32 %v1684_v55, %v1951_v22  ;;  %v528_v57 = vpop.f32.mrb[11].mxu0  ;;  %1714 = vmatmul.mubr.msk.bf16.gmra.mrb[4].mxu1 %vm691_vm2, %v1969_v49  ;;  %v630_v59 = vmax.f32 %v534_v52, 0.0 }
  0xf9   : > { %v529_v58 = vadd.f32 %v1951_v22, %v528_v57  ;;  %v628_v61 = vmax.f32 %v526_v54, 0.0  ;;  %v1225_v57 = vadd.s32 128, %v2012_v46 }
  0xfa   : > { %v631_v60 = vmax.f32 %v537_v56, 0.0 }
  0xfb   : > { %v629_v62 = vmax.f32 %v529_v58, 0.0  ;;  %v1234_v58 = vadd.s32 1, %v1230_v47 }
  0xfc   : > { %v1981_v63 = vpack.c.bf16 %v631_v60, %v630_v59  ;;  %v1226_v59 = vstv %s1472_s16 }
  0xfd   : > { %v1983_v0 = vpack.c.bf16 %v629_v62, %v628_v61  ;;  %v1687_v1 = vpop.f32.mrb[12].mxu0 }
  0xfe   : > { %v550_v2 = vadd.f32 %v1687_v1, %v1951_v22  ;;  %v541_v3 = vpop.f32.mrb[13].mxu0 }
  0xff   : > { %v542_v4 = vadd.f32 %v1951_v22, %v541_v3  ;;  %v1688_v5 = vpop.f32.mrb[14].mxu0  ;;  %1717 = vmatprep.mubr.msk.bf16.mxu1 %vm691_vm2, %v1983_v0  ;;  %v1228_v3 = vadd.s32 %v1226_v59, %v1225_v57 }
 0x100   : > { %v553_v6 = vadd.f32 %v1688_v5, %v1951_v22  ;;  %v544_v7 = vpop.f32.mrb[15].mxu0  ;;  %1718 = vmatmul.mubr.msk.bf16.gmra.mrb[8].mxu1 %vm691_vm2, %v1981_v63  ;;  %v634_v9 = vmax.f32 %v550_v2, 0.0  ;;  %v1235_v5 = vmul.u32 256, %v1234_v58 }
 0x101   : > { %v545_v8 = vadd.f32 %v1951_v22, %v544_v7  ;;  %v632_v11 = vmax.f32 %v542_v4, 0.0  ;;  %v1231_v4 = vmul.u32 256, %v1230_v47 }
 0x102   : > { %v635_v10 = vmax.f32 %v553_v6, 0.0  ;;  %vm1237_vm4 = vcmp.lt.s32.totalorder %v1228_v3, %v1235_v5 }
 0x103   : > { %v633_v12 = vmax.f32 %v545_v8, 0.0  ;;  %vm2030_vm3 = vcmp.ge.s32.totalorder %v1228_v3, %v1231_v4 }
 0x104   : > { %v1993_v13 = vpack.c.bf16 %v635_v10, %v634_v9  ;;  %vm1239_vm5 = vmand %vm2030_vm3, %vm1237_vm4 }
 0x105   : > { %v1995_v14 = vpack.c.bf16 %v633_v12, %v632_v11  ;;  %v1691_v15 = vpop.f32.mrb[16].mxu0  ;;  %vm1475_vm6 = vmpackc.low %vm1239_vm5, %vm1239_vm5 }
 0x106   : > { %v566_v16 = vadd.f32 %v1691_v15, %v1951_v22  ;;  %v557_v17 = vpop.f32.mrb[17].mxu0 }
 0x107   : > { %v558_v18 = vadd.f32 %v1951_v22, %v557_v17  ;;  %v1692_v19 = vpop.f32.mrb[18].mxu0  ;;  %1721 = vmatprep.mubr.msk.bf16.mxu1 %vm691_vm2, %v1995_v14 }
 0x108   : > { %v569_v20 = vadd.f32 %v1692_v19, %v1951_v22  ;;  %v560_v21 = vpop.f32.mrb[19].mxu0  ;;  %1722 = vmatmul.mubr.msk.bf16.gmra.mrb[12].mxu1 %vm691_vm2, %v1993_v13  ;;  %v638_v24 = vmax.f32 %v566_v16, 0.0 }
 0x109   : > { %v561_v23 = vadd.f32 %v1951_v22, %v560_v21  ;;  %v636_v26 = vmax.f32 %v558_v18, 0.0 }
 0x10a   : > { %v639_v25 = vmax.f32 %v569_v20, 0.0  ;;  %v1227_v20 = vadd.s32 %v1226_v59, %v2012_v46 }
 0x10b   : > { %v637_v27 = vmax.f32 %v561_v23, 0.0 }
 0x10c   : > { %v661_v28 = vpack.c.bf16 %v639_v25, %v638_v24  ;;  %vm1232_vm7 = vcmp.ge.s32.totalorder %v1227_v20, %v1231_v4  ;;  %vm1236_vm8 = vcmp.lt.s32.totalorder %v1227_v20, %v1235_v5 }
 0x10d   : > { %v660_v29 = vpack.c.bf16 %v637_v27, %v636_v26  ;;  %v1695_v30 = vpop.f32.mrb[20].mxu0  ;;  %vm1238_vm9 = vmand %vm1232_vm7, %vm1236_vm8 }
 0x10e   : > { %v582_v31 = vadd.f32 %v1695_v30, %v1951_v22  ;;  %v573_v32 = vpop.f32.mrb[21].mxu0  ;;  %vm1477_vm10 = vmpackc.low %vm1238_vm9, %vm1238_vm9 }
 0x10f   : > { %v574_v33 = vadd.f32 %v1951_v22, %v573_v32  ;;  %v1696_v34 = vpop.f32.mrb[22].mxu0  ;;  %1725 = vmatprep.mubr.msk.bf16.mxu1 %vm691_vm2, %v660_v29  ;;  %1645 = vmatprep.subr.bf16.mxu1 %v660_v29 }
 0x110   : > { %v585_v36 = vadd.f32 %v1696_v34, %v1951_v22  ;;  %v576_v38 = vpop.f32.mrb[23].mxu0  ;;  %1726 = vmatmul.mubr.msk.bf16.gmra.mrb[16].mxu1 %vm691_vm2, %v661_v28  ;;  %v642_v41 = vmax.f32 %v582_v31, 0.0 }
 0x111   : > { %v577_v40 = vadd.f32 %v1951_v22, %v576_v38  ;;  %1646 = vmatpush3.bf16.msra.mxu1 %v1959_v37  ;;  %v640_v43 = vmax.f32 %v574_v33, 0.0 }
 0x112   : > { %v643_v42 = vmax.f32 %v585_v36, 0.0  ;;  %1647 = vmatprep.subr.bf16.mxu1 %v661_v28 }
 0x113   : > { %v641_v44 = vmax.f32 %v577_v40, 0.0 }
 0x114   : > { %v663_v45 = vpack.c.bf16 %v643_v42, %v642_v41 }
 0x115   : > { %v662_v48 = vpack.c.bf16 %v641_v44, %v640_v43  ;;  %1648 = vmatpush3.bf16.msra.mxu1 %v1957_v35  ;;  %v1699_v51 = vpop.f32.mrb[24].mxu0 }
 0x116   : > { %v598_v52 = vadd.f32 %v1699_v51, %v1951_v22  ;;  %v589_v53 = vpop.f32.mrb[25].mxu0 }
 0x117   : > { %v590_v54 = vadd.f32 %v1951_v22, %v589_v53  ;;  %v1700_v37 = vpop.f32.mrb[26].mxu0  ;;  %1729 = vmatprep.mubr.msk.bf16.mxu1 %vm691_vm2, %v662_v48  ;;  %1649 = vmatprep.subr.bf16.mxu1 %v662_v48 }
 0x118   : > { %v601_v55 = vadd.f32 %v1700_v37, %v1951_v22  ;;  %v592_v56 = vpop.f32.mrb[27].mxu0  ;;  %1730 = vmatmul.mubr.msk.bf16.gmra.mrb[20].mxu1 %vm691_vm2, %v663_v45  ;;  %v646_v60 = vmax.f32 %v598_v52, 0.0 }
 0x119   : > { %v593_v35 = vadd.f32 %v1951_v22, %v592_v56  ;;  %1650 = vmatpush3.bf16.msra.mxu1 %v1971_v50  ;;  %v644_v62 = vmax.f32 %v590_v54, 0.0 }
 0x11a   : > { %v647_v61 = vmax.f32 %v601_v55, 0.0  ;;  %1651 = vmatprep.subr.bf16.mxu1 %v663_v45 }
 0x11b   : > { %v645_v1 = vmax.f32 %v593_v35, 0.0 }
 0x11c   : > { %v665_v2 = vpack.c.bf16 %v647_v61, %v646_v60 }
 0x11d   : > { %v664_v6 = vpack.c.bf16 %v645_v1, %v644_v62  ;;  %1652 = vmatpush3.bf16.msra.mxu1 %v1969_v49  ;;  %v1703_v7 = vpop.f32.mrb[28].mxu0 }
 0x11e   : > { %v614_v8 = vadd.f32 %v1703_v7, %v1951_v22  ;;  %v605_v9 = vpop.f32.mrb[29].mxu0 }
 0x11f   : > { %v606_v10 = vadd.f32 %v1951_v22, %v605_v9  ;;  %v1704_v50 = vpop.f32.mrb[30].mxu0  ;;  %1733 = vmatprep.mubr.msk.bf16.mxu1 %vm691_vm2, %v664_v6  ;;  %1653 = vmatprep.subr.bf16.mxu1 %v664_v6 }
 0x120   : > { %v617_v11 = vadd.f32 %v1704_v50, %v1951_v22  ;;  %v608_v12 = vpop.f32.mrb[31].mxu0  ;;  %1734 = vmatmul.mubr.msk.bf16.gmra.mrb[24].mxu1 %vm691_vm2, %v665_v2  ;;  %v650_v16 = vmax.f32 %v614_v8, 0.0 }
 0x121   : > { %v609_v49 = vadd.f32 %v1951_v22, %v608_v12  ;;  %1654 = vmatpush3.bf16.msra.mxu1 %v1983_v0  ;;  %v648_v18 = vmax.f32 %v606_v10, 0.0  ;;  %v1844_v22 = vmov 1.0|1.0  }
 0x122   : > { %v651_v17 = vmax.f32 %v617_v11, 0.0  ;;  %1655 = vmatprep.subr.bf16.mxu1 %v665_v2 }
 0x123   : > { %v649_v19 = vmax.f32 %v609_v49, 0.0 }
 0x124   : > { %v667_v21 = vpack.c.bf16 %v651_v17, %v650_v16 }
 0x125   : > { %v666_v23 = vpack.c.bf16 %v649_v19, %v648_v18  ;;  %1656 = vmatpush3.bf16.msra.mxu1 %v1981_v63  ;;  %v2047_v63 = vld [vmem:[%s2294_s4] ss:$0 sm:$0xff] }
 0x127   : > { %1737 = vmatprep.mubr.msk.bf16.mxu1 %vm691_vm2, %v666_v23  ;;  %1657 = vmatprep.subr.bf16.mxu1 %v666_v23 }
 0x128   : > { %1738 = vmatmul.mubr.msk.bf16.gmra.mrb[28].mxu1 %vm691_vm2, %v667_v21 }
 0x129   : > { %1658 = vmatpush3.bf16.msra.mxu1 %v1995_v14  ;;  %1476 = vmatprep.mubr.msk.bf16.mxu1 %vm1475_vm6, %v1844_v22 }
 0x12a   : > { %1659 = vmatprep.subr.bf16.mxu1 %v667_v21 }
 0x12d   : > { %1660 = vmatpush3.bf16.msra.mxu1 %v1993_v13 }
 0x130   : > { %1478 = vmatmul.mubr.msk.bf16.vlgmr.msra.gmra.mrb[32].mxu1 %vm1477_vm10, %v1844_v22 }
 0x1c3   : > { %v1711_v0 = vpop.f32.mrb[0].mxu1 }
 0x1c4   : > { %v783_v24 = vadd.f32 %v1711_v0, %v2047_v63  ;;  %v774_v25 = vpop.f32.mrb[1].mxu1 }
 0x1c5   : > { %v775_v26 = vadd.f32 %v2047_v63, %v774_v25  ;;  %v1712_v14 = vpop.f32.mrb[2].mxu1 }
 0x1c6   : > { %v905_v27 = vmul.f32 0.5, %v783_v24  ;;  %v786_v28 = vadd.f32 %v1712_v14, %v2047_v63  ;;  %v777_v29 = vpop.f32.mrb[3].mxu1 }
 0x1c7   : > { %v903_v30 = vmul.f32 0.5, %v775_v26  ;;  %v778_v13 = vadd.f32 %v2047_v63, %v777_v29 }
 0x1c8   : > { %1772 = vtanh.f32 %v905_v27  ;;  %v906_v31 = vmul.f32 0.5, %v786_v28 }
 0x1c9   : > { %1774 = vtanh.f32 %v903_v30  ;;  %v904_v32 = vmul.f32 0.5, %v778_v13 }
 0x1ca   : > { %1776 = vtanh.f32 %v906_v31 }
 0x1cb   : > { %1778 = vtanh.f32 %v904_v32  ;;  %v1715_v33 = vpop.f32.mrb[4].mxu1 }
 0x1cc   : > { %v2054_v34 = vadd.f32 %v1715_v33, %v2047_v63  ;;  %v790_v36 = vpop.f32.mrb[5].mxu1 }
 0x1cd   : > { %v2057_v38 = vadd.f32 %v2047_v63, %v790_v36  ;;  %v1716_v39 = vpop.f32.mrb[6].mxu1 }
 0x1ce   : > { %v909_v40 = vmul.f32 0.5, %v2054_v34  ;;  %v2061_v41 = vadd.f32 %v1716_v39, %v2047_v63  ;;  %v793_v42 = vpop.f32.mrb[7].mxu1 }
 0x1cf   : > { %v907_v43 = vmul.f32 0.5, %v2057_v38  ;;  %v2065_v44 = vadd.f32 %v2047_v63, %v793_v42 }
 0x1d0   : > { %1780 = vtanh.f32 %v909_v40  ;;  %v910_v45 = vmul.f32 0.5, %v2061_v41 }
 0x1d1   : > { %1782 = vtanh.f32 %v907_v43  ;;  %v908_v47 = vmul.f32 0.5, %v2065_v44 }
 0x1d2   : > { %v1773_v48 = vpop.eup %1772  ;;  %1784 = vtanh.f32 %v910_v45 }
 0x1d3   : > { %v1775_v51 = vpop.eup %1774  ;;  %v969_v52 = vadd.f32 1.0, %v1773_v48  ;;  %1786 = vtanh.f32 %v908_v47  ;;  %v1719_v53 = vpop.f32.mrb[8].mxu1 }
 0x1d4   : > { %v1777_v54 = vpop.eup %1776  ;;  %v967_v37 = vadd.f32 1.0, %v1775_v51  ;;  %v2071_v55 = vadd.f32 %v1719_v53, %v2047_v63  ;;  %v806_v56 = vpop.f32.mrb[9].mxu1 }
 0x1d5   : > { %v1779_v57 = vpop.eup %1778  ;;  %v1001_v58 = vmul.f32 0.5, %v969_v52  ;;  %v970_v35 = vadd.f32 1.0, %v1777_v54  ;;  %v2074_v59 = vadd.f32 %v2047_v63, %v806_v56  ;;  %v1720_v60 = vpop.f32.mrb[10].mxu1 }
 0x1d6   : > { %v999_v61 = vmul.f32 0.5, %v967_v37  ;;  %v968_v62 = vadd.f32 1.0, %v1779_v57  ;;  %v913_v1 = vmul.f32 0.5, %v2071_v55  ;;  %v2078_v2 = vadd.f32 %v1720_v60, %v2047_v63  ;;  %v809_v3 = vpop.f32.mrb[11].mxu1 }
 0x1d7   : > { %v1034_v4 = vsel %vm1031_vm11, %v1001_v58, %v783_v24  ;;  %v1002_v5 = vmul.f32 0.5, %v970_v35  ;;  %v911_v6 = vmul.f32 0.5, %v2074_v59  ;;  %v2084_v7 = vadd.f32 %v2047_v63, %v809_v3 }
 0x1d8   : > { %v1032_v8 = vsel %vm1031_vm11, %v999_v61, %v775_v26  ;;  %v1000_v9 = vmul.f32 0.5, %v968_v62  ;;  %1788 = vtanh.f32 %v913_v1  ;;  %v914_v10 = vmul.f32 0.5, %v2078_v2 }
 0x1d9   : > { %v1035_v50 = vsel %vm1031_vm11, %v1002_v5, %v786_v28  ;;  %1790 = vtanh.f32 %v911_v6  ;;  %v912_v11 = vmul.f32 0.5, %v2084_v7 }
 0x1da   : > { %v1781_v12 = vpop.eup %1780  ;;  %v1521_v15 = vpack.c.bf16 %v1035_v50, %v1034_v4  ;;  %v1033_v49 = vsel %vm1031_vm11, %v1000_v9, %v778_v13  ;;  %1792 = vtanh.f32 %v914_v10 }
 0x1db   : > { %v1783_v16 = vpop.eup %1782  ;;  %v1516_v17 = vpack.c.bf16 %v1033_v49, %v1032_v8  ;;  %v973_v18 = vadd.f32 1.0, %v1781_v12  ;;  %1794 = vtanh.f32 %v912_v11  ;;  %v1723_v19 = vpop.f32.mrb[12].mxu1 }
 0x1dc   : > { %v1785_v20 = vpop.eup %1784  ;;  %1593 = vst [vmem:[%s2094_s23 + $0x8] sm:$0xff] %v1521_v15   ;;  %v971_v21 = vadd.f32 1.0, %v1783_v16  ;;  %v2103_v23 = vadd.f32 %v1723_v19, %v2047_v63  ;;  %v822_v22 = vpop.f32.mrb[13].mxu1 }
 0x1dd   : > { %v1787_v0 = vpop.eup %1786  ;;  %1517 = vst [vmem:[%s2094_s23] sm:$0xff] %v1516_v17   ;;  %v1005_v24 = vmul.f32 0.5, %v973_v18  ;;  %v974_v25 = vadd.f32 1.0, %v1785_v20  ;;  %v2107_v26 = vadd.f32 %v2047_v63, %v822_v22  ;;  %v1724_v14 = vpop.f32.mrb[14].mxu1 }
 0x1de   : > { %v1003_v27 = vmul.f32 0.5, %v971_v21  ;;  %v972_v28 = vadd.f32 1.0, %v1787_v0  ;;  %v917_v29 = vmul.f32 0.5, %v2103_v23  ;;  %v2111_v30 = vadd.f32 %v1724_v14, %v2047_v63  ;;  %v825_v13 = vpop.f32.mrb[15].mxu1 }
 0x1df   : > { %v1038_v31 = vsel %vm1031_vm11, %v1005_v24, %v2054_v34  ;;  %v1006_v32 = vmul.f32 0.5, %v974_v25  ;;  %v915_v33 = vmul.f32 0.5, %v2107_v26  ;;  %v2118_v36 = vadd.f32 %v2047_v63, %v825_v13 }
 0x1e0   : > { %v1036_v39 = vsel %vm1031_vm11, %v1003_v27, %v2057_v38  ;;  %v1004_v40 = vmul.f32 0.5, %v972_v28  ;;  %1796 = vtanh.f32 %v917_v29  ;;  %v918_v42 = vmul.f32 0.5, %v2111_v30 }
 0x1e1   : > { %v1039_v43 = vsel %vm1031_vm11, %v1006_v32, %v2061_v41  ;;  %1798 = vtanh.f32 %v915_v33  ;;  %v916_v34 = vmul.f32 0.5, %v2118_v36 }
 0x1e2   : > { %v1789_v45 = vpop.eup %1788  ;;  %v1531_v47 = vpack.c.bf16 %v1039_v43, %v1038_v31  ;;  %v1037_v48 = vsel %vm1031_vm11, %v1004_v40, %v2065_v44  ;;  %1800 = vtanh.f32 %v918_v42 }
 0x1e3   : > { %v1791_v38 = vpop.eup %1790  ;;  %v1526_v51 = vpack.c.bf16 %v1037_v48, %v1036_v39  ;;  %v977_v52 = vadd.f32 1.0, %v1789_v45  ;;  %1802 = vtanh.f32 %v916_v34  ;;  %v1727_v53 = vpop.f32.mrb[16].mxu1 }
 0x1e4   : > { %v1793_v54 = vpop.eup %1792  ;;  %1595 = vst [vmem:[%s2094_s23 + $0x18] sm:$0xff] %v1531_v47   ;;  %v975_v37 = vadd.f32 1.0, %v1791_v38  ;;  %v2133_v41 = vadd.f32 %v1727_v53, %v2047_v63  ;;  %v838_v56 = vpop.f32.mrb[17].mxu1 }
 0x1e5   : > { %v1795_v57 = vpop.eup %1794  ;;  %1594 = vst [vmem:[%s2094_s23 + $0x10] sm:$0xff] %v1526_v51   ;;  %v1009_v58 = vmul.f32 0.5, %v977_v52  ;;  %v978_v35 = vadd.f32 1.0, %v1793_v54  ;;  %v2137_v60 = vadd.f32 %v2047_v63, %v838_v56  ;;  %v1728_v44 = vpop.f32.mrb[18].mxu1 }
 0x1e6   : > { %v1007_v61 = vmul.f32 0.5, %v975_v37  ;;  %v976_v62 = vadd.f32 1.0, %v1795_v57  ;;  %v921_v1 = vmul.f32 0.5, %v2133_v41  ;;  %v2141_v3 = vadd.f32 %v1728_v44, %v2047_v63  ;;  %v841_v4 = vpop.f32.mrb[19].mxu1 }
 0x1e7   : > { %v1042_v5 = vsel %vm1031_vm11, %v1009_v58, %v2071_v55  ;;  %v1010_v6 = vmul.f32 0.5, %v978_v35  ;;  %v919_v8 = vmul.f32 0.5, %v2137_v60  ;;  %v2148_v9 = vadd.f32 %v2047_v63, %v841_v4 }
 0x1e8   : > { %v1040_v10 = vsel %vm1031_vm11, %v1007_v61, %v2074_v59  ;;  %v1008_v50 = vmul.f32 0.5, %v976_v62  ;;  %1804 = vtanh.f32 %v921_v1  ;;  %v922_v11 = vmul.f32 0.5, %v2141_v3 }
 0x1e9   : > { %v1043_v12 = vsel %vm1031_vm11, %v1010_v6, %v2078_v2  ;;  %1806 = vtanh.f32 %v919_v8  ;;  %v920_v55 = vmul.f32 0.5, %v2148_v9 }
 0x1ea   : > { %v1797_v15 = vpop.eup %1796  ;;  %v1541_v49 = vpack.c.bf16 %v1043_v12, %v1042_v5  ;;  %v1041_v16 = vsel %vm1031_vm11, %v1008_v50, %v2084_v7  ;;  %1808 = vtanh.f32 %v922_v11 }
 0x1eb   : > { %v1799_v59 = vpop.eup %1798  ;;  %v1536_v17 = vpack.c.bf16 %v1041_v16, %v1040_v10  ;;  %v981_v18 = vadd.f32 1.0, %v1797_v15  ;;  %1810 = vtanh.f32 %v920_v55  ;;  %v1731_v19 = vpop.f32.mrb[20].mxu1 }
 0x1ec   : > { %v1801_v20 = vpop.eup %1800  ;;  %1597 = vst [vmem:[%s2094_s23 + $0x28] sm:$0xff] %v1541_v49   ;;  %v979_v21 = vadd.f32 1.0, %v1799_v59  ;;  %v2163_v2 = vadd.f32 %v1731_v19, %v2047_v63  ;;  %v854_v22 = vpop.f32.mrb[21].mxu1 }
 0x1ed   : > { %v1803_v0 = vpop.eup %1802  ;;  %1596 = vst [vmem:[%s2094_s23 + $0x20] sm:$0xff] %v1536_v17   ;;  %v1013_v24 = vmul.f32 0.5, %v981_v18  ;;  %v982_v25 = vadd.f32 1.0, %v1801_v20  ;;  %v2167_v14 = vadd.f32 %v2047_v63, %v854_v22  ;;  %v1732_v7 = vpop.f32.mrb[22].mxu1 }
 0x1ee   : > { %v1011_v27 = vmul.f32 0.5, %v979_v21  ;;  %v980_v28 = vadd.f32 1.0, %v1803_v0  ;;  %v925_v29 = vmul.f32 0.5, %v2163_v2  ;;  %v2171_v13 = vadd.f32 %v1732_v7, %v2047_v63  ;;  %v857_v31 = vpop.f32.mrb[23].mxu1 }
 0x1ef   : > { %v1046_v32 = vsel %vm1031_vm11, %v1013_v24, %v2103_v23  ;;  %v1014_v33 = vmul.f32 0.5, %v982_v25  ;;  %v923_v39 = vmul.f32 0.5, %v2167_v14  ;;  %v2178_v40 = vadd.f32 %v2047_v63, %v857_v31 }
 0x1f0   : > { %v1044_v42 = vsel %vm1031_vm11, %v1011_v27, %v2107_v26  ;;  %v1012_v43 = vmul.f32 0.5, %v980_v28  ;;  %1812 = vtanh.f32 %v925_v29  ;;  %v926_v34 = vmul.f32 0.5, %v2171_v13 }
 0x1f1   : > { %v1047_v45 = vsel %vm1031_vm11, %v1014_v33, %v2111_v30  ;;  %1814 = vtanh.f32 %v923_v39  ;;  %v924_v23 = vmul.f32 0.5, %v2178_v40 }
 0x1f2   : > { %v1805_v47 = vpop.eup %1804  ;;  %v1551_v48 = vpack.c.bf16 %v1047_v45, %v1046_v32  ;;  %v1045_v38 = vsel %vm1031_vm11, %v1012_v43, %v2118_v36  ;;  %1816 = vtanh.f32 %v926_v34 }
 0x1f3   : > { %v1807_v26 = vpop.eup %1806  ;;  %v1546_v51 = vpack.c.bf16 %v1045_v38, %v1044_v42  ;;  %v985_v52 = vadd.f32 1.0, %v1805_v47  ;;  %1818 = vtanh.f32 %v924_v23  ;;  %v1735_v53 = vpop.f32.mrb[24].mxu1 }
 0x1f4   : > { %v1809_v54 = vpop.eup %1808  ;;  %1599 = vst [vmem:[%s2094_s23 + $0x38] sm:$0xff] %v1551_v48   ;;  %v983_v37 = vadd.f32 1.0, %v1807_v26  ;;  %v2193_v30 = vadd.f32 %v1735_v53, %v2047_v63  ;;  %v870_v56 = vpop.f32.mrb[25].mxu1 }
 0x1f5   : > { %v1811_v57 = vpop.eup %1810  ;;  %1598 = vst [vmem:[%s2094_s23 + $0x30] sm:$0xff] %v1546_v51   ;;  %v1017_v58 = vmul.f32 0.5, %v985_v52  ;;  %v986_v35 = vadd.f32 1.0, %v1809_v54  ;;  %v2197_v44 = vadd.f32 %v2047_v63, %v870_v56  ;;  %v1736_v36 = vpop.f32.mrb[26].mxu1 }
 0x1f6   : > { %v1015_v61 = vmul.f32 0.5, %v983_v37  ;;  %v984_v62 = vadd.f32 1.0, %v1811_v57  ;;  %v929_v1 = vmul.f32 0.5, %v2193_v30  ;;  %v2201_v4 = vadd.f32 %v1736_v36, %v2047_v63  ;;  %v873_v5 = vpop.f32.mrb[27].mxu1 }
 0x1f7   : > { %v1050_v6 = vsel %vm1031_vm11, %v1017_v58, %v2133_v41  ;;  %v1018_v8 = vmul.f32 0.5, %v986_v35  ;;  %v927_v10 = vmul.f32 0.5, %v2197_v44  ;;  %v2208_v50 = vadd.f32 %v2047_v63, %v873_v5 }
 0x1f8   : > { %v1048_v11 = vsel %vm1031_vm11, %v1015_v61, %v2137_v60  ;;  %v1016_v12 = vmul.f32 0.5, %v984_v62  ;;  %1820 = vtanh.f32 %v929_v1  ;;  %v930_v55 = vmul.f32 0.5, %v2201_v4 }
 0x1f9   : > { %v1051_v15 = vsel %vm1031_vm11, %v1018_v8, %v2141_v3  ;;  %1822 = vtanh.f32 %v927_v10  ;;  %v928_v41 = vmul.f32 0.5, %v2208_v50 }
 0x1fa   : > { %v1813_v49 = vpop.eup %1812  ;;  %v1561_v16 = vpack.c.bf16 %v1051_v15, %v1050_v6  ;;  %v1049_v60 = vsel %vm1031_vm11, %v1016_v12, %v2148_v9  ;;  %1824 = vtanh.f32 %v930_v55 }
 0x1fb   : > { %v1815_v59 = vpop.eup %1814  ;;  %v1556_v17 = vpack.c.bf16 %v1049_v60, %v1048_v11  ;;  %v989_v18 = vadd.f32 1.0, %v1813_v49  ;;  %1826 = vtanh.f32 %v928_v41  ;;  %v1739_v19 = vpop.f32.mrb[28].mxu1 }
 0x1fc   : > { %v1817_v3 = vpop.eup %1816  ;;  %1601 = vst [vmem:[%s2094_s23 + $0x48] sm:$0xff] %v1561_v16   ;;  %v987_v20 = vadd.f32 1.0, %v1815_v59  ;;  %v2224_v21 = vadd.f32 %v1739_v19, %v2047_v63  ;;  %v886_v22 = vpop.f32.mrb[29].mxu1 }
 0x1fd   : > { %v1819_v0 = vpop.eup %1818  ;;  %1600 = vst [vmem:[%s2094_s23 + $0x40] sm:$0xff] %v1556_v17   ;;  %v1021_v24 = vmul.f32 0.5, %v989_v18  ;;  %v990_v25 = vadd.f32 1.0, %v1817_v3  ;;  %v2228_v9 = vadd.f32 %v2047_v63, %v886_v22  ;;  %v1740_v7 = vpop.f32.mrb[30].mxu1 }
 0x1fe   : > { %v1019_v27 = vmul.f32 0.5, %v987_v20  ;;  %v988_v28 = vadd.f32 1.0, %v1819_v0  ;;  %v933_v29 = vmul.f32 0.5, %v2224_v21  ;;  %v2237_v31 = vadd.f32 %v1740_v7, %v2047_v63  ;;  %v889_v32 = vpop.f32.mrb[31].mxu1 }
 0x1ff   : > { %v1054_v33 = vsel %vm1031_vm11, %v1021_v24, %v2163_v2  ;;  %v1022_v39 = vmul.f32 0.5, %v990_v25  ;;  %v931_v42 = vmul.f32 0.5, %v2228_v9  ;;  %v890_v43 = vadd.f32 %v2047_v63, %v889_v32 }
 0x200   : > { %v1052_v34 = vsel %vm1031_vm11, %v1019_v27, %v2167_v14  ;;  %v1020_v45 = vmul.f32 0.5, %v988_v28  ;;  %1828 = vtanh.f32 %v933_v29  ;;  %v934_v23 = vmul.f32 0.5, %v2237_v31 }
 0x201   : > { %v1055_v47 = vsel %vm1031_vm11, %v1022_v39, %v2171_v13  ;;  %1830 = vtanh.f32 %v931_v42  ;;  %v932_v2 = vmul.f32 0.5, %v890_v43 }
 0x202   : > { %v1821_v48 = vpop.eup %1820  ;;  %v1571_v38 = vpack.c.bf16 %v1055_v47, %v1054_v33  ;;  %v1053_v63 = vsel %vm1031_vm11, %v1020_v45, %v2178_v40  ;;  %1832 = vtanh.f32 %v934_v23 }
 0x203   : > { %v1823_v14 = vpop.eup %1822  ;;  %v1566_v26 = vpack.c.bf16 %v1053_v63, %v1052_v34  ;;  %v993_v51 = vadd.f32 1.0, %v1821_v48  ;;  %1834 = vtanh.f32 %v932_v2  ;;  %v1661_v52 = vpop.f32.mrb[32].mxu1 }
 0x204   : > { %v1825_v53 = vpop.eup %1824  ;;  %1603 = vst [vmem:[%s2094_s23 + $0x58] sm:$0xff] %v1571_v38   ;;  %v991_v54 = vadd.f32 1.0, %v1823_v14  ;;  %v1662_v13 = vpop.f32.mrb[33].mxu1 }
 0x205   : > { %v1827_v37 = vpop.eup %1826  ;;  %1602 = vst [vmem:[%s2094_s23 + $0x50] sm:$0xff] %v1566_v26   ;;  %v1025_v56 = vmul.f32 0.5, %v993_v51  ;;  %v994_v57 = vadd.f32 1.0, %v1825_v53  ;;  %v1663_v40 = vadd.f32 %v1662_v13, %v1661_v52  ;;  %v1664_v58 = vpop.f32.mrb[34].mxu1 }
 0x206   : > { %v1023_v35 = vmul.f32 0.5, %v991_v54  ;;  %v992_v36 = vadd.f32 1.0, %v1827_v37  ;;  %v1665_v61 = vpop.f32.mrb[35].mxu1 }
 0x207   : > { %v1058_v62 = vsel %vm1031_vm11, %v1025_v56, %v2193_v30  ;;  %v1026_v1 = vmul.f32 0.5, %v994_v57  ;;  %1287 = vst.msk [vmem:[%s265_s22] sm:$0x3] %vm1286_vm12, %v1663_v40 }
 0x208   : > { %v1056_v5 = vsel %vm1031_vm11, %v1023_v35, %v2197_v44  ;;  %v1024_v6 = vmul.f32 0.5, %v992_v36 }
 0x209   : > { %v1059_v8 = vsel %vm1031_vm11, %v1026_v1, %v2201_v4 }
 0x20a   : > { %v1829_v10 = vpop.eup %1828  ;;  %v1581_v11 = vpack.c.bf16 %v1059_v8, %v1058_v62  ;;  %v1057_v12 = vsel %vm1031_vm11, %v1024_v6, %v2208_v50 }
 0x20b   : > { %v1831_v55 = vpop.eup %1830  ;;  %v1576_v30 = vpack.c.bf16 %v1057_v12, %v1056_v5  ;;  %v997_v15 = vadd.f32 1.0, %v1829_v10 }
 0x20c   : > { %v1833_v41 = vpop.eup %1832  ;;  %1605 = vst [vmem:[%s2094_s23 + $0x68] sm:$0xff] %v1581_v11   ;;  %v995_v49 = vadd.f32 1.0, %v1831_v55 }
 0x20d   : > { %v1835_v44 = vpop.eup %1834  ;;  %1604 = vst [vmem:[%s2094_s23 + $0x60] sm:$0xff] %v1576_v30   ;;  %v1029_v16 = vmul.f32 0.5, %v997_v15  ;;  %v998_v60 = vadd.f32 1.0, %v1833_v41 }
 0x20e   : > { %v1027_v59 = vmul.f32 0.5, %v995_v49  ;;  %v996_v4 = vadd.f32 1.0, %v1835_v44 }
 0x20f   : > { %v1062_v17 = vsel %vm1031_vm11, %v1029_v16, %v2224_v21  ;;  %v1030_v18 = vmul.f32 0.5, %v998_v60 }
 0x210   : > { %v1060_v50 = vsel %vm1031_vm11, %v1027_v59, %v2228_v9  ;;  %v1028_v19 = vmul.f32 0.5, %v996_v4 }
 0x211   : > { %v1063_v3 = vsel %vm1031_vm11, %v1030_v18, %v2237_v31 }
 0x212   : > { %v1591_v20 = vpack.c.bf16 %v1063_v3, %v1062_v17  ;;  %v1061_v22 = vsel %vm1031_vm11, %v1028_v19, %v890_v43 }
 0x213   : > { %v1586_v0 = vpack.c.bf16 %v1061_v22, %v1060_v50 }
 0x214   : > { %1607 = vst [vmem:[%s2094_s23 + $0x78] sm:$0xff] %v1591_v20  }
 0x215   : > { %1606 = vst [vmem:[%s2094_s23 + $0x70] sm:$0xff] %v1586_v0  }
 0x216 PF: > { %s17_s21 = sadd.s32 1, %s1842_s21  }
 0x217   : > { %p14_p5 = scmp.ge.s32.totalorder %s17_s21, 4  }
 0x219   :  { %16 = sbr.rel (!%p14_p5) target bundleno = 1 (0x1), region = 82 }

</bundles_post_ra>
